<compile_context>
chip_gen: v7x
topology: tpu7x:2x2x1
jax: 0.10.0
libtpu: 0.0.40
codegen_flags: <defaults>
</compile_context>

<pallas_src>
import jax
import jax.numpy as jnp
from jax import lax
from jax.experimental import pallas as pl
from jax.experimental.pallas import tpu as pltpu


# --------------------------------------------------------------------------- #
# Path 1: resident-table MXU kernel (per-feature table fits comfortably in VMEM)
# --------------------------------------------------------------------------- #
def _fp_ebc_mxu_kernel(ids_ref,    # VMEM (1, tb, L) int32
                       len_ref,    # VMEM (1, tb, 1) int32
                       posw_ref,   # VMEM (1, 1, L)  f32
                       tbl_ref,    # VMEM (1, N, D)  bf16  (resident across bb)
                       out_ref):   # VMEM (tb, D)    f32   (lane-dense output tile)
    _, tb, L = ids_ref.shape
    N = tbl_ref.shape[1]

    # Feature processor: per-position weight, zeroed past each bag's length.
    lens = len_ref[0]                                    # (tb, 1) int32
    posw = posw_ref[0]                                   # (1, L)  f32
    pos = lax.broadcasted_iota(jnp.int32, (tb, L), 1)    # (tb, L)
    w = jnp.where(pos < lens, posw, 0.0)                 # (tb, L) f32

    # Weighted one-hot A[b, n] = sum_l w[b, l] * (ids[b, l] == n).
    ids = ids_ref[0]                                     # (tb, L) int32
    col = lax.broadcasted_iota(jnp.int32, (tb, N), 1)    # hoisted out of the loop
    a = jnp.zeros((tb, N), jnp.float32)
    for l in range(L):                                   # L is small and static
        a = a + jnp.where(col == ids[:, l][:, None], w[:, l][:, None], 0.0)

    # Pooling on the MXU: (tb, N) @ (N, D), f32 accumulation.
    out_ref[...] = jnp.dot(a.astype(jnp.bfloat16), tbl_ref[0],
                           preferred_element_type=jnp.float32)


# --------------------------------------------------------------------------- #
# Path 2: HBM row-gather kernel with cross-step double-buffered prefetch.
# --------------------------------------------------------------------------- #
def _fp_ebc_gather_kernel(ids_ref,    # SMEM (F, B*L) int32   (scalar-prefetched)
                          len_ref,    # VMEM (1, tb, 1) int32
                          posw_ref,   # VMEM (1, 1, L)  f32
                          tbl_ref,    # HBM  (F, N, D)  bf16  (memory_space=pl.ANY)
                          out_ref,    # VMEM (tb, D)    f32
                          gath_ref,   # VMEM (2, tb, L, D) bf16  double-buffered gather
                          sem_ref):   # DMA semaphores (2,)
    f = pl.program_id(0)
    bb = pl.program_id(1)
    nbb = pl.num_programs(1)
    _, tb, L, D = gath_ref.shape
    N = tbl_ref.shape[1]

    def issue_tile(tile_idx, slot):
        """Issue tb*L row gathers (feature f, batch tile `tile_idx`) into `slot`."""
        b0 = tile_idx * tb

        def body_b(b, carry):
            base = (b0 + b) * L

            def body_l(l, carry2):
                rid = ids_ref[f, base + l]
                rid = jnp.minimum(jnp.maximum(rid, 0), N - 1)   # guard bad/corrupt ids
                pltpu.make_async_copy(
                    tbl_ref.at[pl.ds(f, 1), pl.ds(rid, 1), :],
                    gath_ref.at[slot, pl.ds(b, 1), pl.ds(l, 1), :],
                    sem_ref.at[slot],
                ).start()
                return carry2

            return lax.fori_loop(0, L, body_l, carry, unroll=True)

        lax.fori_loop(0, tb, body_b, 0)

    # First batch tile of this feature: issue its own gathers (latency exposed only
    # once per feature).
    @pl.when(bb == 0)
    def _():
        issue_tile(bb, bb % 2)

    # Cross-step prefetch: issue the NEXT batch tile's gathers into the other slot.
    # The bb axis is "arbitrary" (runs in order, per feature, on one core), so the
    # tile prefetched here is always consumed by the next grid step on this core.
    @pl.when(bb + 1 < nbb)
    def _():
        issue_tile(bb + 1, (bb + 1) % 2)

    # Feature processor (overlaps with the in-flight gather DMAs).
    lens = len_ref[0]                                    # (tb, 1) int32
    posw = posw_ref[0]                                   # (1, L)  f32
    pos = lax.broadcasted_iota(jnp.int32, (tb, L), 1)    # (tb, L)
    w = jnp.where(pos < lens, posw, 0.0)                 # (tb, L) f32

    # ONE aggregate wait for this tile's gathers: every issued copy is an identical
    # (1, 1, D) bf16 row, so the total signaled size for this slot is exactly
    # tb*L*D*2 bytes == the size of the whole slot descriptor below.
    slot = bb % 2
    pltpu.make_async_copy(gath_ref.at[slot], gath_ref.at[slot],
                          sem_ref.at[slot]).wait()

    # Weighted SUM pooling: loop over L, live set stays ~2 x (tb, D) f32.
    acc = jnp.zeros((tb, D), jnp.float32)
    for l in range(L):                                   # L is small and static
        acc = acc + gath_ref[slot, :, l, :].astype(jnp.float32) * w[:, l][:, None]
    out_ref[...] = acc.astype(out_ref.dtype)


# --------------------------------------------------------------------------- #
# Wrapper
# --------------------------------------------------------------------------- #
def fp_ebc_forward(ids, lengths, pos_weights, tables, *, tb=128,
                   mxu_table_budget_bytes=8 * 1024 * 1024, force_path=None):
    """FeatureProcessedEmbeddingBagCollection forward.

    Returns KeyedTensor.values(): f32 [B, F*D], per-key D-wide blocks in key order.
    """
    F, B, L = ids.shape
    Ft, N, D = tables.shape
    assert Ft == F
    # Lane-dense output requires the per-key embedding dim padded to a multiple of 128.
    assert D % 128 == 0, "pad embedding dim to a multiple of 128"
    tb = min(tb, B)
    assert B % tb == 0 and tb % 8 == 0

    ids32 = ids.astype(jnp.int32)
    len3 = lengths.reshape(F, B, 1).astype(jnp.int32)
    posw3 = pos_weights.reshape(F, 1, L).astype(jnp.float32)
    tables_bf16 = tables.astype(jnp.bfloat16)   # halves gather/stream bytes; f32 accum

    # Path selection: resident-table MXU path when one bf16 table fits a conservative
    # VMEM budget (re-derive per generation: v7x has 64 MiB VMEM vs 128 MiB v5e/v6e)
    # and the one-hot build stays cheap; otherwise HBM row-gather.
    use_mxu = (N * D * 2 <= mxu_table_budget_bytes) and (N <= 8192)
    if force_path == "gather":
        use_mxu = False
    elif force_path == "mxu":
        use_mxu = True

    if use_mxu:
        return pl.pallas_call(
            _fp_ebc_mxu_kernel,
            out_shape=jax.ShapeDtypeStruct((B, F * D), jnp.float32),
            grid_spec=pltpu.PrefetchScalarGridSpec(
                num_scalar_prefetch=0,
                grid=(F, B // tb),
                in_specs=[
                    pl.BlockSpec((1, tb, L), lambda f, bb: (f, bb, 0)),   # ids
                    pl.BlockSpec((1, tb, 1), lambda f, bb: (f, bb, 0)),   # lengths
                    pl.BlockSpec((1, 1, L), lambda f, bb: (f, 0, 0)),     # pos weights
                    # Index constant in bb -> table block is DMA'd once per feature and
                    # stays resident in VMEM across all batch tiles of that feature.
                    pl.BlockSpec((1, N, D), lambda f, bb: (f, 0, 0)),     # table
                ],
                out_specs=pl.BlockSpec((tb, D), lambda f, bb: (bb, f)),
            ),
            compiler_params=pltpu.CompilerParams(
                dimension_semantics=("parallel", "parallel"),
                vmem_limit_bytes=64 * 1024 * 1024,
            ),
        )(ids32, len3, posw3, tables_bf16)

    # Gather path: table stays in HBM, rows are DMA-gathered with cross-step prefetch.
    # TODO(synk): at production F*B*L, move the flattened ids from whole-array scalar
    # prefetch to per-tile SMEM blocks (SMEM is small); kept as prefetch for simplicity.
    ids_flat = ids32.reshape(F, B * L)
    return pl.pallas_call(
        _fp_ebc_gather_kernel,
        out_shape=jax.ShapeDtypeStruct((B, F * D), jnp.float32),
        grid_spec=pltpu.PrefetchScalarGridSpec(
            num_scalar_prefetch=1,                  # ids -> SMEM, drive the row DMAs
            grid=(F, B // tb),
            in_specs=[
                pl.BlockSpec((1, tb, 1), lambda f, bb, ids_s: (f, bb, 0)),   # lengths
                pl.BlockSpec((1, 1, L), lambda f, bb, ids_s: (f, 0, 0)),     # pos wts
                pl.BlockSpec(memory_space=pl.ANY),                           # table HBM
            ],
            out_specs=pl.BlockSpec((tb, D), lambda f, bb, ids_s: (bb, f)),
            scratch_shapes=[
                pltpu.VMEM((2, tb, L, D), jnp.bfloat16),   # double-buffered gather
                pltpu.SemaphoreType.DMA((2,)),             # one DMA sem per slot
            ],
        ),
        compiler_params=pltpu.CompilerParams(
            # bb must run in order per feature for the cross-step prefetch; the
            # feature axis still shards across TensorCores (v7x megacore).
            dimension_semantics=("parallel", "arbitrary"),
            vmem_limit_bytes=64 * 1024 * 1024,
        ),
    )(ids_flat, len3, posw3, tables_bf16)


def _reference_forward(ids, lengths, pos_weights, tables):
    """Pure-JAX reference (tables quantized to bf16 to match kernel storage)."""
    F, B, L = ids.shape
    D = tables.shape[-1]
    tq = tables.astype(jnp.bfloat16).astype(jnp.float32)
    pos = jnp.arange(L)[None, None, :]
    mask = pos < lengths[:, :, None]                        # (F, B, L)
    w = jnp.where(mask, pos_weights[:, None, :], 0.0)       # (F, B, L)
    emb = jax.vmap(lambda t, i: t[i])(tq, ids)              # (F, B, L, D)
    pooled = jnp.sum(emb * w[..., None], axis=2)            # (F, B, D)
    return jnp.transpose(pooled, (1, 0, 2)).reshape(B, F * D)


if __name__ == "__main__":
    # Small synthetic config: 2 features (keys), batch 16, max bag length 8,
    # 256 rows per embedding table, embedding dim 128 (lane-dense).
    F, B, L, N, D = 2, 16, 8, 256, 128

    key = jax.random.PRNGKey(0)
    k_ids, k_len, k_posw, k_tab = jax.random.split(key, 4)

    ids = jax.random.randint(k_ids, (F, B, L), 0, N, dtype=jnp.int32)
    lengths = jax.random.randint(k_len, (F, B), 0, L + 1, dtype=jnp.int32)
    # PositionWeightedModule params (torchrec inits to ones; perturbed to be non-trivial).
    pos_weights = 1.0 + 0.1 * jax.random.normal(k_posw, (F, L), dtype=jnp.float32)
    tables = jax.random.normal(k_tab, (F, N, D), dtype=jnp.float32) * 0.05

    ref = _reference_forward(ids, lengths, pos_weights, tables)

    # Auto-selected path (small table -> resident-table MXU kernel).
    out_mxu = jax.block_until_ready(fp_ebc_forward(ids, lengths, pos_weights, tables))
    assert out_mxu.shape == (B, F * D), out_mxu.shape
    assert jnp.allclose(out_mxu, ref, atol=2e-2, rtol=2e-2), "MXU path mismatch"

    # Also exercise the HBM row-gather path (used for large tables in production).
    out_gather = jax.block_until_ready(
        fp_ebc_forward(ids, lengths, pos_weights, tables, force_path="gather"))
    assert out_gather.shape == (B, F * D), out_gather.shape
    assert jnp.allclose(out_gather, ref, atol=2e-2, rtol=2e-2), "gather path mismatch"

    # TODO(synk): true jagged (variable-stride) KJT containers and the KeyedTensor
    # dict wrapper have no Pallas equivalent; represented as dense-padded ids+lengths
    # and a flat [B, F*D] values tensor (one table per key, SUM pooling).
    print("KERNEL_OK")
</pallas_src>

<mosaic_0001>
module attributes {stable_mosaic.version = 11 : i64} {
  func.func @_fp_ebc_mxu_kernel(%arg0: i32, %arg1: i32, %arg2: memref<1x16x8xi32, #tpu.memory_space<vmem>>, %arg3: memref<1x16x1xi32, #tpu.memory_space<vmem>>, %arg4: memref<1x1x8xf32, #tpu.memory_space<vmem>>, %arg5: memref<1x256x128xbf16, #tpu.memory_space<vmem>>, %arg6: memref<16x128xf32, #tpu.memory_space<vmem>>) attributes {dimension_semantics = [#tpu.dimension_semantics<parallel>, #tpu.dimension_semantics<parallel>], iteration_bounds = array<i64: 2, 1>, scalar_prefetch = 0 : i64, scratch_operands = 0 : i64, tpu.core_type = #tpu.core_type<tc>, window_params = [{transform_indices = @transform_0, window_bounds = array<i64: 1, 16, 8>}, {transform_indices = @transform_1, window_bounds = array<i64: 1, 16, 1>}, {transform_indices = @transform_2, window_bounds = array<i64: 1, 1, 8>}, {transform_indices = @transform_3, window_bounds = array<i64: 1, 256, 128>}, {transform_indices = @transform_4, window_bounds = array<i64: 16, 128>}]} {
    %c0 = arith.constant 0 : index
    %c0_0 = arith.constant 0 : index
    %c0_1 = arith.constant 0 : index
    %0 = vector.load %arg3[%c0, %c0_0, %c0_1] : memref<1x16x1xi32, #tpu.memory_space<vmem>>, vector<1x16x1xi32>
    %1 = vector.shape_cast %0 : vector<1x16x1xi32> to vector<16x1xi32>
    %c0_2 = arith.constant 0 : index
    %c0_3 = arith.constant 0 : index
    %c0_4 = arith.constant 0 : index
    %2 = vector.load %arg4[%c0_2, %c0_3, %c0_4] : memref<1x1x8xf32, #tpu.memory_space<vmem>>, vector<1x1x8xf32>
    %3 = vector.shape_cast %2 : vector<1x1x8xf32> to vector<1x8xf32>
    %4 = tpu.iota {dimensions = array<i32: 1>} : vector<16x8xi32>
    %5 = vector.broadcast %1 : vector<16x1xi32> to vector<16x8xi32>
    %6 = arith.cmpi slt, %4, %5 : vector<16x8xi32>
    %cst = arith.constant 0.000000e+00 : f32
    %7 = vector.shape_cast %3 : vector<1x8xf32> to vector<1x8xf32>
    %8 = vector.broadcast %7 : vector<1x8xf32> to vector<16x8xf32>
    %9 = vector.broadcast %cst : f32 to vector<16x8xf32>
    %10 = arith.select %6, %8, %9 : vector<16x8xi1>, vector<16x8xf32>
    %c0_5 = arith.constant 0 : index
    %c0_6 = arith.constant 0 : index
    %c0_7 = arith.constant 0 : index
    %11 = vector.load %arg2[%c0_5, %c0_6, %c0_7] : memref<1x16x8xi32, #tpu.memory_space<vmem>>, vector<1x16x8xi32>
    %12 = vector.shape_cast %11 : vector<1x16x8xi32> to vector<16x8xi32>
    %13 = tpu.iota {dimensions = array<i32: 1>} : vector<16x256xi32>
    %cst_8 = arith.constant 0.000000e+00 : f32
    %14 = vector.broadcast %cst_8 : f32 to vector<16x256xf32>
    %15 = vector.extract_strided_slice %12 {offsets = [0, 0], sizes = [16, 1], strides = [1, 1]} : vector<16x8xi32> to vector<16x1xi32>
    %16 = vector.shape_cast %15 : vector<16x1xi32> to vector<16xi32>
    %17 = vector.shape_cast %16 : vector<16xi32> to vector<16x1xi32>
    %18 = vector.broadcast %17 : vector<16x1xi32> to vector<16x256xi32>
    %19 = arith.cmpi eq, %13, %18 : vector<16x256xi32>
    %20 = vector.extract_strided_slice %10 {offsets = [0, 0], sizes = [16, 1], strides = [1, 1]} : vector<16x8xf32> to vector<16x1xf32>
    %21 = vector.shape_cast %20 : vector<16x1xf32> to vector<16xf32>
    %22 = vector.shape_cast %21 : vector<16xf32> to vector<16x1xf32>
    %cst_9 = arith.constant 0.000000e+00 : f32
    %23 = vector.shape_cast %22 : vector<16x1xf32> to vector<16x1xf32>
    %24 = vector.broadcast %23 : vector<16x1xf32> to vector<16x256xf32>
    %25 = vector.broadcast %cst_9 : f32 to vector<16x256xf32>
    %26 = arith.select %19, %24, %25 : vector<16x256xi1>, vector<16x256xf32>
    %27 = arith.addf %14, %26 : vector<16x256xf32>
    %28 = vector.extract_strided_slice %12 {offsets = [0, 1], sizes = [16, 1], strides = [1, 1]} : vector<16x8xi32> to vector<16x1xi32>
    %29 = vector.shape_cast %28 : vector<16x1xi32> to vector<16xi32>
    %30 = vector.shape_cast %29 : vector<16xi32> to vector<16x1xi32>
    %31 = vector.broadcast %30 : vector<16x1xi32> to vector<16x256xi32>
    %32 = arith.cmpi eq, %13, %31 : vector<16x256xi32>
    %33 = vector.extract_strided_slice %10 {offsets = [0, 1], sizes = [16, 1], strides = [1, 1]} : vector<16x8xf32> to vector<16x1xf32>
    %34 = vector.shape_cast %33 : vector<16x1xf32> to vector<16xf32>
    %35 = vector.shape_cast %34 : vector<16xf32> to vector<16x1xf32>
    %cst_10 = arith.constant 0.000000e+00 : f32
    %36 = vector.shape_cast %35 : vector<16x1xf32> to vector<16x1xf32>
    %37 = vector.broadcast %36 : vector<16x1xf32> to vector<16x256xf32>
    %38 = vector.broadcast %cst_10 : f32 to vector<16x256xf32>
    %39 = arith.select %32, %37, %38 : vector<16x256xi1>, vector<16x256xf32>
    %40 = arith.addf %27, %39 : vector<16x256xf32>
    %41 = vector.extract_strided_slice %12 {offsets = [0, 2], sizes = [16, 1], strides = [1, 1]} : vector<16x8xi32> to vector<16x1xi32>
    %42 = vector.shape_cast %41 : vector<16x1xi32> to vector<16xi32>
    %43 = vector.shape_cast %42 : vector<16xi32> to vector<16x1xi32>
    %44 = vector.broadcast %43 : vector<16x1xi32> to vector<16x256xi32>
    %45 = arith.cmpi eq, %13, %44 : vector<16x256xi32>
    %46 = vector.extract_strided_slice %10 {offsets = [0, 2], sizes = [16, 1], strides = [1, 1]} : vector<16x8xf32> to vector<16x1xf32>
    %47 = vector.shape_cast %46 : vector<16x1xf32> to vector<16xf32>
    %48 = vector.shape_cast %47 : vector<16xf32> to vector<16x1xf32>
    %cst_11 = arith.constant 0.000000e+00 : f32
    %49 = vector.shape_cast %48 : vector<16x1xf32> to vector<16x1xf32>
    %50 = vector.broadcast %49 : vector<16x1xf32> to vector<16x256xf32>
    %51 = vector.broadcast %cst_11 : f32 to vector<16x256xf32>
    %52 = arith.select %45, %50, %51 : vector<16x256xi1>, vector<16x256xf32>
    %53 = arith.addf %40, %52 : vector<16x256xf32>
    %54 = vector.extract_strided_slice %12 {offsets = [0, 3], sizes = [16, 1], strides = [1, 1]} : vector<16x8xi32> to vector<16x1xi32>
    %55 = vector.shape_cast %54 : vector<16x1xi32> to vector<16xi32>
    %56 = vector.shape_cast %55 : vector<16xi32> to vector<16x1xi32>
    %57 = vector.broadcast %56 : vector<16x1xi32> to vector<16x256xi32>
    %58 = arith.cmpi eq, %13, %57 : vector<16x256xi32>
    %59 = vector.extract_strided_slice %10 {offsets = [0, 3], sizes = [16, 1], strides = [1, 1]} : vector<16x8xf32> to vector<16x1xf32>
    %60 = vector.shape_cast %59 : vector<16x1xf32> to vector<16xf32>
    %61 = vector.shape_cast %60 : vector<16xf32> to vector<16x1xf32>
    %cst_12 = arith.constant 0.000000e+00 : f32
    %62 = vector.shape_cast %61 : vector<16x1xf32> to vector<16x1xf32>
    %63 = vector.broadcast %62 : vector<16x1xf32> to vector<16x256xf32>
    %64 = vector.broadcast %cst_12 : f32 to vector<16x256xf32>
    %65 = arith.select %58, %63, %64 : vector<16x256xi1>, vector<16x256xf32>
    %66 = arith.addf %53, %65 : vector<16x256xf32>
    %67 = vector.extract_strided_slice %12 {offsets = [0, 4], sizes = [16, 1], strides = [1, 1]} : vector<16x8xi32> to vector<16x1xi32>
    %68 = vector.shape_cast %67 : vector<16x1xi32> to vector<16xi32>
    %69 = vector.shape_cast %68 : vector<16xi32> to vector<16x1xi32>
    %70 = vector.broadcast %69 : vector<16x1xi32> to vector<16x256xi32>
    %71 = arith.cmpi eq, %13, %70 : vector<16x256xi32>
    %72 = vector.extract_strided_slice %10 {offsets = [0, 4], sizes = [16, 1], strides = [1, 1]} : vector<16x8xf32> to vector<16x1xf32>
    %73 = vector.shape_cast %72 : vector<16x1xf32> to vector<16xf32>
    %74 = vector.shape_cast %73 : vector<16xf32> to vector<16x1xf32>
    %cst_13 = arith.constant 0.000000e+00 : f32
    %75 = vector.shape_cast %74 : vector<16x1xf32> to vector<16x1xf32>
    %76 = vector.broadcast %75 : vector<16x1xf32> to vector<16x256xf32>
    %77 = vector.broadcast %cst_13 : f32 to vector<16x256xf32>
    %78 = arith.select %71, %76, %77 : vector<16x256xi1>, vector<16x256xf32>
    %79 = arith.addf %66, %78 : vector<16x256xf32>
    %80 = vector.extract_strided_slice %12 {offsets = [0, 5], sizes = [16, 1], strides = [1, 1]} : vector<16x8xi32> to vector<16x1xi32>
    %81 = vector.shape_cast %80 : vector<16x1xi32> to vector<16xi32>
    %82 = vector.shape_cast %81 : vector<16xi32> to vector<16x1xi32>
    %83 = vector.broadcast %82 : vector<16x1xi32> to vector<16x256xi32>
    %84 = arith.cmpi eq, %13, %83 : vector<16x256xi32>
    %85 = vector.extract_strided_slice %10 {offsets = [0, 5], sizes = [16, 1], strides = [1, 1]} : vector<16x8xf32> to vector<16x1xf32>
    %86 = vector.shape_cast %85 : vector<16x1xf32> to vector<16xf32>
    %87 = vector.shape_cast %86 : vector<16xf32> to vector<16x1xf32>
    %cst_14 = arith.constant 0.000000e+00 : f32
    %88 = vector.shape_cast %87 : vector<16x1xf32> to vector<16x1xf32>
    %89 = vector.broadcast %88 : vector<16x1xf32> to vector<16x256xf32>
    %90 = vector.broadcast %cst_14 : f32 to vector<16x256xf32>
    %91 = arith.select %84, %89, %90 : vector<16x256xi1>, vector<16x256xf32>
    %92 = arith.addf %79, %91 : vector<16x256xf32>
    %93 = vector.extract_strided_slice %12 {offsets = [0, 6], sizes = [16, 1], strides = [1, 1]} : vector<16x8xi32> to vector<16x1xi32>
    %94 = vector.shape_cast %93 : vector<16x1xi32> to vector<16xi32>
    %95 = vector.shape_cast %94 : vector<16xi32> to vector<16x1xi32>
    %96 = vector.broadcast %95 : vector<16x1xi32> to vector<16x256xi32>
    %97 = arith.cmpi eq, %13, %96 : vector<16x256xi32>
    %98 = vector.extract_strided_slice %10 {offsets = [0, 6], sizes = [16, 1], strides = [1, 1]} : vector<16x8xf32> to vector<16x1xf32>
    %99 = vector.shape_cast %98 : vector<16x1xf32> to vector<16xf32>
    %100 = vector.shape_cast %99 : vector<16xf32> to vector<16x1xf32>
    %cst_15 = arith.constant 0.000000e+00 : f32
    %101 = vector.shape_cast %100 : vector<16x1xf32> to vector<16x1xf32>
    %102 = vector.broadcast %101 : vector<16x1xf32> to vector<16x256xf32>
    %103 = vector.broadcast %cst_15 : f32 to vector<16x256xf32>
    %104 = arith.select %97, %102, %103 : vector<16x256xi1>, vector<16x256xf32>
    %105 = arith.addf %92, %104 : vector<16x256xf32>
    %106 = vector.extract_strided_slice %12 {offsets = [0, 7], sizes = [16, 1], strides = [1, 1]} : vector<16x8xi32> to vector<16x1xi32>
    %107 = vector.shape_cast %106 : vector<16x1xi32> to vector<16xi32>
    %108 = vector.shape_cast %107 : vector<16xi32> to vector<16x1xi32>
    %109 = vector.broadcast %108 : vector<16x1xi32> to vector<16x256xi32>
    %110 = arith.cmpi eq, %13, %109 : vector<16x256xi32>
    %111 = vector.extract_strided_slice %10 {offsets = [0, 7], sizes = [16, 1], strides = [1, 1]} : vector<16x8xf32> to vector<16x1xf32>
    %112 = vector.shape_cast %111 : vector<16x1xf32> to vector<16xf32>
    %113 = vector.shape_cast %112 : vector<16xf32> to vector<16x1xf32>
    %cst_16 = arith.constant 0.000000e+00 : f32
    %114 = vector.shape_cast %113 : vector<16x1xf32> to vector<16x1xf32>
    %115 = vector.broadcast %114 : vector<16x1xf32> to vector<16x256xf32>
    %116 = vector.broadcast %cst_16 : f32 to vector<16x256xf32>
    %117 = arith.select %110, %115, %116 : vector<16x256xi1>, vector<16x256xf32>
    %118 = arith.addf %105, %117 : vector<16x256xf32>
    %119 = arith.truncf %118 : vector<16x256xf32> to vector<16x256xbf16>
    %c0_17 = arith.constant 0 : index
    %c0_18 = arith.constant 0 : index
    %c0_19 = arith.constant 0 : index
    %120 = vector.load %arg5[%c0_17, %c0_18, %c0_19] : memref<1x256x128xbf16, #tpu.memory_space<vmem>>, vector<1x256x128xbf16>
    %121 = vector.shape_cast %120 : vector<1x256x128xbf16> to vector<256x128xbf16>
    %cst_20 = arith.constant dense<0.000000e+00> : vector<16x128xf32>
    %122 = tpu.matmul %119, %121, %cst_20 {dimension_numbers = #tpu.dot_dimension_numbers<[1], [0], [0], [1], [0, 0, 1, 1], [], []>} : vector<16x256xbf16>, vector<256x128xbf16>, vector<16x128xf32> -> vector<16x128xf32>
    %c0_21 = arith.constant 0 : index
    %c0_22 = arith.constant 0 : index
    %123 = vector.load %arg6[%c0_21, %c0_22] : memref<16x128xf32, #tpu.memory_space<vmem>>, vector<16x128xf32>
    tpu.vector_store %arg6[%c0_21, %c0_22], %122 {strides = array<i32>} : memref<16x128xf32, #tpu.memory_space<vmem>>, vector<16x128xf32>,
    return
  }
  func.func @transform_0(%arg0: i32, %arg1: i32) -> (i32, i32, i32) {
    %c0_i32 = arith.constant 0 : i32
    %c0_i32_0 = arith.constant 0 : i32
    return %arg0, %arg1, %c0_i32 : i32, i32, i32
  }
  func.func @transform_1(%arg0: i32, %arg1: i32) -> (i32, i32, i32) {
    %c0_i32 = arith.constant 0 : i32
    %c0_i32_0 = arith.constant 0 : i32
    return %arg0, %arg1, %c0_i32 : i32, i32, i32
  }
  func.func @transform_2(%arg0: i32, %arg1: i32) -> (i32, i32, i32) {
    %c0_i32 = arith.constant 0 : i32
    %c0_i32_0 = arith.constant 0 : i32
    %c0_i32_1 = arith.constant 0 : i32
    return %arg0, %c0_i32, %c0_i32_0 : i32, i32, i32
  }
  func.func @transform_3(%arg0: i32, %arg1: i32) -> (i32, i32, i32) {
    %c0_i32 = arith.constant 0 : i32
    %c0_i32_0 = arith.constant 0 : i32
    %c0_i32_1 = arith.constant 0 : i32
    return %arg0, %c0_i32, %c0_i32_0 : i32, i32, i32
  }
  func.func @transform_4(%arg0: i32, %arg1: i32) -> (i32, i32) {
    %c0_i32 = arith.constant 0 : i32
    return %arg1, %arg0 : i32, i32
  }
}

</mosaic_0001>

<bundles_post_ra>
// kernel: tpu_custom_call.1
= control target key start
LH: loop header
LB: loop body
LE: loop exit
PB: predicated region body
PF: predicated region fallthrough
CT: control target
= control target key end

     0   :  { %s1864_s0 = inlined_call_operand.hbm [shape: s32[2,16,8], index: 0, kind: input, shape index: {}]   ;;  %s1865_s1 = inlined_call_operand.hbm [shape: s32[2,16,1], index: 1, kind: input, shape index: {}]   ;;  %s1866_s2 = inlined_call_operand.hbm [shape: f32[2,1,8], index: 2, kind: input, shape index: {}]   ;;  %s1867_s3 = inlined_call_operand.hbm [shape: bf16[2,256,128], index: 3, kind: input, shape index: {}]   ;;  %s1868_s4 = inlined_call_operand.hbm [shape: f32[16,256], index: 4, kind: output, shape index: {}]  }
   0x1   :  { %1877 = sst [smem:[#allocation17_spill]] %s1864_s0 }
   0x2   :  { %1878 = sst [smem:[#allocation18_spill]] %s1865_s1 }
   0x3   :  { %9 = vsyncpa [#allocation3], 0 }
   0x4   :  { %11 = vsyncpa [#allocation3 + $0x1], 0 }
   0x5   :  { %12 = vsyncpa [#allocation6], 0 }
   0x6   :  { %14 = vsyncpa [#allocation6 + $0x1], 0 }
   0x7   :  { %15 = vsyncpa [#allocation9], 0 }
   0x8   :  { %17 = vsyncpa [#allocation9 + $0x1], 0 }
   0x9   :  { %18 = vsyncpa [#allocation4], 0 }
   0xa   :  { %20 = vsyncpa [#allocation4 + $0x1], 0  ;;  %s1386_s15 = smov 0   ;;  %s1388_s16 = smov 0  }
   0xb   :  { %s1390_s17 = smov 0   ;;  %s1392_s18 = smov 0  }
   0xc   :  { %s1394_s19 = smov 0   ;;  %s1396_s20 = smov 0  }
   0xd LB: > { %s1417_s21 = sadd.s32 4294967295, %s1339_s20   ;;  %s929_s22 = sadd.s32 4294967294, %s1339_s20   ;;  %s1339_s20 = sphi %s1396_s20, %s26_s20   ;;  %s1335_s19 = sphi %s1394_s19, %s1910_s19   ;;  %s1331_s18 = sphi %s1392_s18, %s1909_s18   ;;  %s1327_s17 = sphi %s1390_s17, %s1908_s17   ;;  %s1323_s16 = sphi %s1388_s16, %s1907_s16   ;;  %s1319_s15 = sphi %s1386_s15, %s1906_s15  }
   0xe   : > { %s38_s23 = sadd.s32 1, %s1335_s19  ;;  %s47_s24 = sadd.s32 1, %s1327_s17 }
   0xf   : > { %p40_p0 = scmp.ge.s32.totalorder %s38_s23, 2  ;;  %p54_p1 = scmp.ne.s32.totalorder %s1327_s17, %s1323_s16 }
  0x10   : > { %p55_p2 = scmp.eq.s32.totalorder %s1339_s20, 0  ;;  %p60_p3 = scmp.ne.s32.totalorder %s1323_s16, %s1319_s15 }
  0x11   : > { %s1912_s23 = smov (%p40_p0, %s38_s23), 0  ;;  %p61_p5 = scmp.eq.s32.totalorder %s1417_s21, 0 }
  0x12   : > { %1879 = sst [smem:[#allocation15_spill]] %s1912_s23  ;;  %p1429_p4 = por %p55_p2, %p54_p1 }
  0x13   : > { %s42_s26 = ssub.s32 %s1335_s19, %s1912_s23  ;;  %p166_p6 = scmp.eq.s32.totalorder %s1417_s21, 1 }
  0x14   : > { %p45_p7 = scmp.eq.s32.totalorder %s42_s26, 0  ;;  %p1437_p8 = por %p61_p5, %p60_p3 }
  0x15   : > { %p1441_p9 = por %p166_p6, %p54_p1  ;;  %p172_p10 = scmp.eq.s32.totalorder %s929_s22, 1 }
  0x16   : > { %s1881_s27 = scalar_select %p1437_p8, 1, 0 }
  0x17   : > { %s1882_s28 = scalar_select %p1441_p9, 1, 0 }
  0x18   : > { %s1446_s29 = scalar_select %p45_p7, %s1327_s17, %s47_s24  }
  0x19   : > { %p1448_p11 = por %p172_p10, %p60_p3  ;;  %p1020_p13 = scmp.lt.s32.totalorder %s1339_s20, 2 }
  0x1a   : > { %1883 = sst [smem:[#allocation16_spill]] %s1446_s29  ;;  %s1455_s5 = sand.u32 1, %s1327_s17  }
  0x1b   : > { %s1884_s30 = scalar_select %p1448_p11, 1, 0 }
  0x1c   : > { %s1869_s6 = sshll.u32 %s1455_s5, 4  ;;  %s968_s7 = sshll.u32 %s1335_s19, 8 }
  0x1d   : > { %p1461_p0 = pnand %p1020_p13, %p1429_p4  ;;  %s215_s9 = sand.u32 1, %s1339_s20  }
  0x1e   : > { %s1886_s1 = sld [smem:[#allocation18_spill]]  ;;  %s219_s13 = scalar_lea.vmem [#allocation5], %s1869_s6 }
  0x1f   : > { %s1885_s8 = scalar_select %p1461_p0, 1, 0 }
  0x20   : > { %s228_s14 = sshll.u32 %s219_s13, 4  ;;  %s1479_s22 = scalar_lea.sflag [#allocation6], %s215_s9  ;;  %s1476_s14 = int_to_ptr.vmem [resolvable:$true] %s228_s14 }
  0x21   : > { %p1485_p4 = pneg %p1461_p0 }
  0x24   : > { %s1471_s12 = scalar_lea.hbm %s1886_s1, %s968_s7  ;;  %s1134_s11 = scalar_lea.hbm %s1886_s1, 512 }
  0x25   : > { %s1129_s24 = scalar_lea.hbm %s1471_s12, 256  ;;  %p1135_p7 = scmp.lt.u32.totalorder %s1471_s12, %s1886_s1 }
  0x26   : > { %p1130_p3 = scmp.ne.s32.totalorder %s1471_s12, %s1129_s24  ;;  %p1136_p10 = scmp.lt.u32.totalorder %s1134_s11, %s1129_s24 }
  0x27   : > { %p1138_p12 = scmp.lt.u32.totalorder %s1129_s24, %s1471_s12 }
  0x28   : > { %p1132_p5 = pnand %p1485_p4, %p1130_p3  ;;  %p1137_p13 = por %p1136_p10, %p1135_p7 }
  0x2a   : > { %p1133_p6 = pneg %p1132_p5  ;;  %p1139_p1 = por %p1138_p12, %p1137_p13 }
  0x2c   : > { %p1140_p2 = pnand %p1139_p1, %p1133_p6 }
  0x2e   : > { %1143 = shalt.err (!%p1140_p2)
}
  0x2f   : > { %s1144_s9 = scalar_lea.vmem %s1476_s14, 256  ;;  %s1341_s26 = smov [#allocation5]  }
  0x30   : > { %p1145_p3 = scmp.ne.s32.totalorder %s1476_s14, %s1144_s9  ;;  %s1149_s10 = sshll.u32 %s1341_s26, 4  ;;  %s1150_s10 = int_to_ptr.vmem [resolvable:$false] %s1149_s10 }
  0x31   : > { %s1151_s6 = scalar_lea.vmem %s1150_s10, 512  ;;  %p1152_p9 = scmp.lt.s32.totalorder %s1476_s14, %s1150_s10 }
  0x32   : > { %p1147_p5 = pnand %p1145_p3, %p1485_p4  ;;  %p1153_p8 = scmp.lt.s32.totalorder %s1151_s6, %s1144_s9 }
  0x34   : > { %p1148_p11 = pneg %p1147_p5  ;;  %p1154_p7 = por %p1153_p8, %p1152_p9 }
  0x36   : > { %p1155_p10 = pnand %p1154_p7, %p1148_p11 }
  0x38   : > { %1158 = shalt.err (!%p1155_p10)
}
  0x39   : > { %s1873_s24 = smov 128   ;;  %s1874_s11 = smov 8  }
  0x3a   : > { %1009 = dma.hbm_to_vmem [thread:$0]  (!%p1461_p0), %s1471_s12, 256, %s1476_s14, %s1479_s22, %s1873_s24, %s1873_s24, %s1874_s11  }
  0x3b   : > { %p1888_p8 = scmp.lt.s32.totalorder %s1339_s20, 3  ;;  %p1889_p9 = scmp.ge.s32.totalorder %s1339_s20, 1 }
  0x3c   : > { %s1891_s0 = sld [smem:[#allocation17_spill]]  ;;  %s1892_s6 = sshll.u32 %s1455_s5, 4 }
  0x3d   : > { %p1516_p11 = pnand %p1889_p9, %p1888_p8  ;;  %s196_s1 = scalar_lea.vmem [#allocation2], %s1892_s6 }
  0x3e   : > { %s205_s23 = sshll.u32 %s196_s1, 4  ;;  %s938_s12 = sshll.u32 %s1335_s19, 4  ;;  %s1529_s23 = int_to_ptr.vmem [resolvable:$true] %s205_s23 }
  0x3f   : > { %s1890_s13 = scalar_select %p1516_p11, 1, 0 }
  0x40   : > { %s193_s14 = scalar_lea.sflag [#allocation3], %s1455_s5 }
  0x42   : > { %s1525_s10 = scalar_lea.hbm %s1891_s0, %s968_s7  ;;  %s1164_s7 = scalar_lea.hbm %s1891_s0, 512 }
  0x43   : > { %s1159_s24 = scalar_lea.hbm %s1525_s10, 256  ;;  %p1165_p6 = scmp.lt.u32.totalorder %s1525_s10, %s1891_s0 }
  0x44   : > { %p1160_p12 = scmp.ne.s32.totalorder %s1525_s10, %s1159_s24  ;;  %p1166_p13 = scmp.lt.u32.totalorder %s1164_s7, %s1159_s24 }
  0x45   : > { %p1168_p5 = scmp.lt.u32.totalorder %s1159_s24, %s1525_s10 }
  0x46   : > { %p1162_p1 = pnand %p1160_p12, %p1485_p4  ;;  %p1167_p3 = por %p1166_p13, %p1165_p6 }
  0x48   : > { %p1163_p2 = pneg %p1162_p1  ;;  %p1169_p7 = por %p1168_p5, %p1167_p3 }
  0x4a   : > { %p1170_p10 = pnand %p1169_p7, %p1163_p2 }
  0x4c   : > { %1173 = shalt.err (!%p1170_p10)
}
  0x4d   : > { %s1174_s1 = scalar_lea.vmem %s1529_s23, 256  ;;  %s1344_s11 = smov [#allocation2]  }
  0x4e   : > { %p1175_p8 = scmp.ne.s32.totalorder %s1529_s23, %s1174_s1  ;;  %s1179_s6 = sshll.u32 %s1344_s11, 4  ;;  %s1180_s6 = int_to_ptr.vmem [resolvable:$false] %s1179_s6 }
  0x4f   : > { %s1181_s29 = scalar_lea.vmem %s1180_s6, 512  ;;  %p1182_p1 = scmp.lt.s32.totalorder %s1529_s23, %s1180_s6 }
  0x50   : > { %p1177_p9 = pnand %p1175_p8, %p1485_p4  ;;  %p1183_p11 = scmp.lt.s32.totalorder %s1181_s29, %s1174_s1 }
  0x52   : > { %p1178_p12 = pneg %p1177_p9  ;;  %p1184_p6 = por %p1183_p11, %p1182_p1 }
  0x54   : > { %p1185_p13 = pnand %p1184_p6, %p1178_p12 }
  0x56   : > { %1188 = shalt.err (!%p1185_p13)
}
  0x57   : > { %s1893_s24 = smov 8   ;;  %s1894_s9 = smov 128  }
  0x58   : > { %1006 = dma.hbm_to_vmem [thread:$0]  (!%p1461_p0), %s1525_s10, 256, %s1529_s23, %s193_s14, %s1894_s9, %s1894_s9, %s1893_s24  }
  0x59   : > { %s1564_s1 = scalar_lea.hbm %s1866_s2, %s938_s12  ;;  %s241_s11 = scalar_lea.vmem [#allocation7], %s1455_s5 }
  0x5a   : > { %s248_s6 = sshll.u32 %s241_s11, 4  ;;  %s1189_s29 = scalar_lea.hbm %s1564_s1, 16  ;;  %s249_s6 = int_to_ptr.vmem [resolvable:$true] %s248_s6 }
  0x5b   : > { %p1190_p11 = scmp.ne.s32.totalorder %s1564_s1, %s1189_s29  ;;  %s1194_s10 = scalar_lea.hbm %s1866_s2, 32 }
  0x5c   : > { %p1195_p5 = scmp.lt.u32.totalorder %s1564_s1, %s1866_s2  ;;  %p1196_p7 = scmp.lt.u32.totalorder %s1194_s10, %s1189_s29 }
  0x5d   : > { %p1192_p2 = pnand %p1190_p11, %p1485_p4  ;;  %p1198_p8 = scmp.lt.u32.totalorder %s1189_s29, %s1564_s1 }
  0x5e   : > { %p1197_p10 = por %p1196_p7, %p1195_p5 }
  0x5f   : > { %p1193_p3 = pneg %p1192_p2 }
  0x60   : > { %p1199_p9 = por %p1198_p8, %p1197_p10 }
  0x62   : > { %p1200_p12 = pnand %p1199_p9, %p1193_p3 }
  0x64   : > { %1203 = shalt.err (!%p1200_p12)
}
  0x65   : > { %s1204_s12 = scalar_lea.vmem %s249_s6, 16  ;;  %s1345_s9 = smov [#allocation7]  }
  0x66   : > { %p1205_p1 = scmp.ne.s32.totalorder %s249_s6, %s1204_s12  ;;  %s1209_s7 = sshll.u32 %s1345_s9, 4  ;;  %s1210_s7 = int_to_ptr.vmem [resolvable:$false] %s1209_s7 }
  0x67   : > { %s1211_s0 = scalar_lea.vmem %s1210_s7, 32  ;;  %p1212_p11 = scmp.lt.s32.totalorder %s249_s6, %s1210_s7 }
  0x68   : > { %p1207_p6 = pnand %p1205_p1, %p1485_p4  ;;  %p1213_p2 = scmp.lt.s32.totalorder %s1211_s0, %s1204_s12 }
  0x6a   : > { %p1208_p13 = pneg %p1207_p6  ;;  %p1214_p0 = por %p1213_p2, %p1212_p11 }
  0x6c   : > { %p1215_p5 = pnand %p1214_p0, %p1208_p13 }
  0x6e   : > { %1218 = shalt.err (!%p1215_p5)
}
  0x6f   : > { %p1895_p7 = scmp.ne.s32.totalorder %s1885_s8, 0  ;;  %s939_s26 = sshll.u32 %s1455_s5, 7 }
  0x70   : > { %s970_s11 = sshll.u32 %s1335_s19, 11  ;;  %s259_s14 = scalar_lea.vmem [#allocation8], %s939_s26 }
  0x71   : > { %1012 = dma.hbm_to_vmem [thread:$0]  (!%p1895_p7), %s1564_s1, 16, %s249_s6, %s1479_s22  }
  0x72   : > { %s1590_s10 = scalar_lea.hbm %s1867_s3, %s970_s11  ;;  %s266_s24 = sshll.u32 %s259_s14, 4  ;;  %s1592_s24 = int_to_ptr.vmem [resolvable:$true] %s266_s24 }
  0x73   : > { %s256_s12 = scalar_lea.sflag [#allocation9], %s1455_s5  ;;  %s1219_s9 = scalar_lea.hbm %s1590_s10, 2048 }
  0x74   : > { %p1220_p0 = scmp.ne.s32.totalorder %s1590_s10, %s1219_s9  ;;  %s1224_s6 = scalar_lea.hbm %s1867_s3, 4096 }
  0x75   : > { %p1225_p8 = scmp.lt.u32.totalorder %s1590_s10, %s1867_s3  ;;  %p1226_p9 = scmp.lt.u32.totalorder %s1224_s6, %s1219_s9 }
  0x76   : > { %p1222_p3 = pnand %p1220_p0, %p1485_p4  ;;  %p1228_p1 = scmp.lt.u32.totalorder %s1219_s9, %s1590_s10 }
  0x77   : > { %p1227_p12 = por %p1226_p9, %p1225_p8 }
  0x78   : > { %p1223_p10 = pneg %p1222_p3 }
  0x79   : > { %p1229_p6 = por %p1228_p1, %p1227_p12 }
  0x7b   : > { %p1230_p13 = pnand %p1229_p6, %p1223_p10 }
  0x7d   : > { %1233 = shalt.err (!%p1230_p13)
}
  0x7e   : > { %s1234_s26 = scalar_lea.vmem %s1592_s24, 2048  ;;  %s1346_s11 = smov [#allocation8]  }
  0x7f   : > { %p1235_p11 = scmp.ne.s32.totalorder %s1592_s24, %s1234_s26  ;;  %s1239_s29 = sshll.u32 %s1346_s11, 4  ;;  %s1240_s29 = int_to_ptr.vmem [resolvable:$false] %s1239_s29 }
  0x80   : > { %s1241_s23 = scalar_lea.vmem %s1240_s29, 4096  ;;  %p1242_p0 = scmp.lt.s32.totalorder %s1592_s24, %s1240_s29 }
  0x81   : > { %p1237_p2 = pnand %p1235_p11, %p1485_p4  ;;  %p1243_p3 = scmp.lt.s32.totalorder %s1241_s23, %s1234_s26 }
  0x83   : > { %p1238_p5 = pneg %p1237_p2  ;;  %p1244_p8 = por %p1243_p3, %p1242_p0 }
  0x85   : > { %p1245_p9 = pnand %p1244_p8, %p1238_p5 }
  0x87   : > { %1248 = shalt.err (!%p1245_p9)
}
  0x88   : > { %s1347_s14 = smov 64   ;;  %s1348_s9 = smov 4  }
  0x89   : > { %1015 = dma.hbm_to_vmem [thread:$0]  (!%p1895_p7), %s1590_s10, 2048, %s1592_s24, %s256_s12, %s1347_s14, %s1347_s14, %s1348_s9  }
  0x8a   : > { %p1896_p4 = scmp.ne.s32.totalorder %s1890_s13, 0 }
  0x8b   : > { %s1621_s25 = sand.u32 (!%p1896_p4), 1, %s1323_s16   ;;  %p1897_p10 = scmp.ne.s32.totalorder (!%p1896_p4), %s1881_s27, 0 }
  0x8c   : > { %278 = sbr.rel (%p1896_p4) target bundleno = 704 (0x2c0), region = 36  ;;  %s1624_s22 = sshll.u32 (!%p1896_p4), %s1621_s25, 4 }
  0x8d   : > { %s281_s1 = scalar_lea.sflag (!%p1896_p4), [#allocation3], %s1621_s25  ;;  %s284_s6 = scalar_lea.vmem (!%p1896_p4), [#allocation2], %s1624_s22 }
  0x93   : > { %1302 = dma.done.wait (%p1897_p10), %s281_s1, 256  }
  0x94   : > { %1304 = vsyncadd (%p1897_p10), %s281_s1, 4294967040  ;;  %s289_s5 = sand.u32 1, %s1417_s21   ;;  %s293_s13 = scalar_lea.vmem [#allocation5], %s1624_s22 }
  0x95   : > { %s290_s8 = scalar_lea.sflag [#allocation6], %s289_s5 }
  0x96   : > { %1306 = dma.done.wait (%p1897_p10), %s290_s8, 272  }
  0x97   : > { %1308 = vsyncadd (%p1897_p10), %s290_s8, 4294967024  ;;  %s945_s10 = sshll.u32 %s1621_s25, 7  ;;  %s301_s24 = scalar_lea.vmem [#allocation7], %s1621_s25 }
  0x98   : > { %s307_s12 = scalar_lea.sflag [#allocation9], %s1621_s25  ;;  %s1641_s7 = scalar_lea.vmem [#allocation8], %s945_s10 }
  0x99   : > { %1310 = dma.done.wait (%p1897_p10), %s307_s12, 2048  }
  0x9a   : > { %1312 = vsyncadd (%p1897_p10), %s307_s12, 4294965248  ;;  %v1349_v0 = vmov 0   ;;  %v353_v1 = vld [vmem:[%s293_s13] sm:$0xff]  ;;  %v354_v3 = vld [vmem:[%s293_s13 + $0x8] sm:$0xff]  ;;  %v1350_v5 = vmov 1   ;;  %v1351_v6 = vmov 2   ;;  %v356_v12 = vlaneseq }
  0x9b   : > { %1085 = vset.pattern.permute.xlu0 %v1349_v0  ;;  %1086 = vset.pattern.permute.xlu1 %v1349_v0  ;;  %v374_v2 = vld [vmem:[%s284_s6] sm:$0xff]  ;;  %v1647_v4 = vld [vmem:[%s284_s6 + $0x8] sm:$0xff]  ;;  %v1352_v7 = vmov 3   ;;  %v1353_v8 = vmov 4   ;;  %v1354_v9 = vmov 5   ;;  %v1355_v10 = vmov 6  }
  0x9c   : > { %359 = vperm.xlu0 %1085, %v353_v1   ;;  %378 = vperm.xlu1 %1086, %v374_v2   ;;  %v1356_v11 = vmov 7   ;;  %v1656_v13 = vand.u32 127, %v356_v12  ;;  %v947_v14 = vld [vmem:[%s301_s24] ss:$0 sm:$0xff]  ;;  %v1113_v19 = vld [vmem:[%s1641_s7 + $0x40] sm:$0xff]   ;;  %v1115_v21 = vld [vmem:[%s1641_s7 + $0x48] sm:$0xff]  }
  0x9d   : > { %v1114_v20 = vld [vmem:[%s1641_s7] sm:$0xff]   ;;  %971 = vmatprep.subr.bf16.mxu0 %v1113_v19  ;;  %v1116_v22 = vld [vmem:[%s1641_s7 + $0x8] sm:$0xff]   ;;  %v1117_v23 = vld [vmem:[%s1641_s7 + $0x50] sm:$0xff]   ;;  %s348_s21 = scalar_lea.vmem [#allocation10], %s1624_s22  ;;  %s965_s0 = sshll.u32 %s1331_s18, 7 }
  0x9e   : > { %972 = vmatpush3.bf16.msra.mxu0 %v1114_v20  ;;  %v1118_v24 = vld [vmem:[%s1641_s7 + $0x10] sm:$0xff]   ;;  %v1119_v25 = vld [vmem:[%s1641_s7 + $0x58] sm:$0xff]   ;;  %v1121_v27 = vld [vmem:[%s1641_s7 + $0x60] sm:$0xff]   ;;  %v1698_v57 = vadd.s32 128, %v1656_v13  ;;  %s776_s27 = sshll.u32 %s348_s21, 4  ;;  %s1815_s29 = scalar_lea.hbm %s1868_s4, %s965_s0  ;;  %s1810_s27 = int_to_ptr.vmem [resolvable:$true] %s776_s27 }
  0x9f   : > { %973 = vmatprep.subr.bf16.mxu0 %v1115_v21  ;;  %v1120_v26 = vld [vmem:[%s1641_s7 + $0x18] sm:$0xff]   ;;  %v1122_v28 = vld [vmem:[%s1641_s7 + $0x20] sm:$0xff]   ;;  %v1123_v29 = vld [vmem:[%s1641_s7 + $0x68] sm:$0xff]   ;;  %s761_s23 = scalar_lea.sflag [#allocation4], %s1621_s25  ;;  %s1249_s14 = scalar_lea.vmem %s1810_s27, 256 }
  0xa0   : > { %362 = vperm.xlu0 %1085, %v354_v3   ;;  %381 = vperm.xlu1 %1086, %v1647_v4   ;;  %v1124_v30 = vld [vmem:[%s1641_s7 + $0x28] sm:$0xff]   ;;  %v1125_v31 = vld [vmem:[%s1641_s7 + $0x70] sm:$0xff]   ;;  %v1127_v33 = vld [vmem:[%s1641_s7 + $0x78] sm:$0xff]   ;;  %p1250_p7 = scmp.ne.s32.totalorder %s1810_s27, %s1249_s14  ;;  %p1901_p12 = scmp.ne.s32.totalorder %s1882_s28, 0 }
  0xa1   : > { %v1126_v32 = vld [vmem:[%s1641_s7 + $0x30] sm:$0xff]   ;;  %v1128_v34 = vld [vmem:[%s1641_s7 + $0x38] sm:$0xff]   ;;  %s1357_s18 = smov [#allocation10]  }
  0xa2   : > { %974 = vmatpush3.bf16.msra.mxu0 %v1116_v22  ;;  %p1251_p1 = pnand %p1250_p7, %p1901_p12  ;;  %s1253_s9 = sshll.u32 %s1357_s18, 4  ;;  %s1254_s9 = int_to_ptr.vmem [resolvable:$false] %s1253_s9 }
  0xa3   : > { %975 = vmatprep.subr.bf16.mxu0 %v1117_v23  ;;  %s1255_s22 = scalar_lea.vmem %s1254_s9, 512  ;;  %p1256_p13 = scmp.lt.s32.totalorder %s1810_s27, %s1254_s9 }
  0xa4   : > { %1088 = vset.pattern.permute.xlu1 %v1350_v5  ;;  %1087 = vset.pattern.permute.xlu0 %v1350_v5  ;;  %p1252_p6 = pneg %p1251_p1  ;;  %p1257_p11 = scmp.lt.s32.totalorder %s1255_s22, %s1249_s14 }
  0xa5   : > { %409 = vperm.xlu1 %1088, %v1647_v4   ;;  %406 = vperm.xlu0 %1087, %v374_v2  }
  0xa6   : > { %976 = vmatpush3.bf16.msra.mxu0 %v1118_v24  ;;  %p1258_p2 = por %p1257_p11, %p1256_p13 }
  0xa7   : > { %977 = vmatprep.subr.bf16.mxu0 %v1119_v25 }
  0xa8   : > { %p1259_p5 = pnand %p1258_p2, %p1252_p6 }
  0xa9   : > { %1090 = vset.pattern.permute.xlu1 %v1351_v6  ;;  %1089 = vset.pattern.permute.xlu0 %v1351_v6 }
  0xaa   : > { %435 = vperm.xlu1 %1090, %v1647_v4   ;;  %432 = vperm.xlu0 %1089, %v374_v2  }
  0xab   : > { %978 = vmatpush3.bf16.msra.mxu0 %v1120_v26 }
  0xac   : > { %979 = vmatprep.subr.bf16.mxu0 %v1121_v27 }
  0xae   : > { %1091 = vset.pattern.permute.xlu1 %v1352_v7  ;;  %1092 = vset.pattern.permute.xlu0 %v1352_v7 }
  0xaf   : > { %458 = vperm.xlu1 %1091, %v374_v2   ;;  %461 = vperm.xlu0 %1092, %v1647_v4  }
  0xb0   : > { %980 = vmatpush3.bf16.msra.mxu0 %v1122_v28 }
  0xb1   : > { %981 = vmatprep.subr.bf16.mxu0 %v1123_v29 }
  0xb3   : > { %1094 = vset.pattern.permute.xlu1 %v1353_v8  ;;  %1093 = vset.pattern.permute.xlu0 %v1353_v8 }
  0xb4   : > { %487 = vperm.xlu1 %1094, %v1647_v4   ;;  %484 = vperm.xlu0 %1093, %v374_v2  }
  0xb5   : > { %982 = vmatpush3.bf16.msra.mxu0 %v1124_v30 }
  0xb6   : > { %983 = vmatprep.subr.bf16.mxu0 %v1125_v31 }
  0xb8   : > { %1095 = vset.pattern.permute.xlu1 %v1354_v9  ;;  %1096 = vset.pattern.permute.xlu0 %v1354_v9 }
  0xb9   : > { %510 = vperm.xlu1 %1095, %v374_v2   ;;  %513 = vperm.xlu0 %1096, %v1647_v4  }
  0xba   : > { %984 = vmatpush3.bf16.msra.mxu0 %v1126_v32 }
  0xbb   : > { %985 = vmatprep.subr.bf16.mxu0 %v1127_v33 }
  0xbd   : > { %1098 = vset.pattern.permute.xlu1 %v1355_v10  ;;  %1097 = vset.pattern.permute.xlu0 %v1355_v10 }
  0xbe   : > { %539 = vperm.xlu1 %1098, %v1647_v4   ;;  %536 = vperm.xlu0 %1097, %v374_v2  }
  0xbf   : > { %986 = vmatpush3.bf16.msra.mxu0 %v1128_v34 }
  0xc2   : > { %1099 = vset.pattern.permute.xlu1 %v1356_v11  ;;  %1101 = vset.pattern.permute.xlu0 %v1349_v0 }
  0xc3   : > { %562 = vperm.xlu1 %1099, %v374_v2  }
  0xc7   : > { %1100 = vset.pattern.permute.xlu1 %v1349_v0 }
 0x11b   : > { %v360_v15 = vpop.permute.xlu0 %359  ;;  %v1679_v35 = vpop.permute.xlu1 %378 }
 0x11c   : > { %vm364_vm0 = vcmp.lt.s32.totalorder %v1656_v13, %v360_v15  ;;  %vm383_vm2 = vcmp.eq.s32.totalorder %v1656_v13, %v1679_v35  ;;  %vm384_vm3 = vcmp.eq.s32.totalorder %v1698_v57, %v1679_v35 }
 0x11d   : > { %v372_v16 = vsel %vm364_vm0, %v947_v14, 0.0 }
 0x11e   : > { %389 = vperm.xlu1 %1100, %v372_v16  }
 0x11f   : > { %v363_v17 = vpop.permute.xlu0 %362  ;;  %v382_v36 = vpop.permute.xlu1 %381 }
 0x120   : > { %vm365_vm1 = vcmp.lt.s32.totalorder %v1656_v13, %v363_v17  ;;  %vm385_vm4 = vcmp.eq.s32.totalorder %v1656_v13, %v382_v36  ;;  %vm386_vm5 = vcmp.eq.s32.totalorder %v1698_v57, %v382_v36 }
 0x121   : > { %v373_v18 = vsel %vm365_vm1, %v947_v14, 0.0 }
 0x122   : > { %1102 = vset.pattern.permute.xlu1 %v1350_v5  ;;  %394 = vperm.xlu0 %1101, %v373_v18  }
 0x123   : > { %416 = vperm.xlu1 %1102, %v372_v16  }
 0x124   : > { %v410_v37 = vpop.permute.xlu1 %409  ;;  %v407_v42 = vpop.permute.xlu0 %406 }
 0x125   : > { %vm413_vm6 = vcmp.eq.s32.totalorder %v1656_v13, %v410_v37  ;;  %vm414_vm7 = vcmp.eq.s32.totalorder %v1698_v57, %v410_v37  ;;  %vm411_vm8 = vcmp.eq.s32.totalorder %v1656_v13, %v407_v42  ;;  %vm412_vm9 = vcmp.eq.s32.totalorder %v1698_v57, %v407_v42 }
 0x126   : > { %1104 = vset.pattern.permute.xlu0 %v1351_v6 }
 0x127   : > { %420 = vperm.xlu1 %1102, %v373_v18   ;;  %446 = vperm.xlu0 %1104, %v373_v18  }
 0x129   : > { %v436_v38 = vpop.permute.xlu1 %435  ;;  %v433_v44 = vpop.permute.xlu0 %432 }
 0x12a   : > { %vm439_vm10 = vcmp.eq.s32.totalorder %v1656_v13, %v436_v38  ;;  %vm440_vm11 = vcmp.eq.s32.totalorder %v1698_v57, %v436_v38  ;;  %vm437_vm12 = vcmp.eq.s32.totalorder %v1656_v13, %v433_v44  ;;  %vm438_vm13 = vcmp.eq.s32.totalorder %v1698_v57, %v433_v44 }
 0x12b   : > { %1103 = vset.pattern.permute.xlu1 %v1351_v6  ;;  %1107 = vset.pattern.permute.xlu0 %v1353_v8 }
 0x12c   : > { %442 = vperm.xlu1 %1103, %v372_v16   ;;  %498 = vperm.xlu0 %1107, %v373_v18  }
 0x12e   : > { %v1681_v39 = vpop.permute.xlu1 %458  ;;  %v462_v46 = vpop.permute.xlu0 %461 }
 0x12f   : > { %vm465_vm0 = vcmp.eq.s32.totalorder %v1656_v13, %v462_v46  ;;  %vm466_vm1 = vcmp.eq.s32.totalorder %v1698_v57, %v462_v46 }
 0x130   : > { %1105 = vset.pattern.permute.xlu1 %v1352_v7  ;;  %1110 = vset.pattern.permute.xlu0 %v1355_v10 }
 0x131   : > { %468 = vperm.xlu1 %1105, %v372_v16   ;;  %550 = vperm.xlu0 %1110, %v373_v18  }
 0x133   : > { %v1683_v40 = vpop.permute.xlu1 %487  ;;  %v1691_v49 = vpop.permute.xlu0 %484 }
 0x134   : > { %vm489_vm14 = vcmp.eq.s32.totalorder %v1656_v13, %v1691_v49  ;;  %vm490_vm15 = vcmp.eq.s32.totalorder %v1698_v57, %v1691_v49 }
 0x135   : > { %472 = vperm.xlu1 %1105, %v373_v18   ;;  %1111 = vset.pattern.permute.xlu0 %v1356_v11 }
 0x136   : > { %565 = vperm.xlu0 %1111, %v1647_v4  }
 0x138   : > { %v1685_v41 = vpop.permute.xlu1 %510  ;;  %v1693_v51 = vpop.permute.xlu0 %513 }
 0x139   : > { %1106 = vset.pattern.permute.xlu1 %v1353_v8 }
 0x13a   : > { %494 = vperm.xlu1 %1106, %v372_v16  }
 0x13d   : > { %v1687_v43 = vpop.permute.xlu1 %539  ;;  %v1695_v53 = vpop.permute.xlu0 %536 }
 0x13e   : > { %1108 = vset.pattern.permute.xlu1 %v1354_v9 }
 0x13f   : > { %520 = vperm.xlu1 %1108, %v372_v16  }
 0x142   : > { %v1689_v45 = vpop.permute.xlu1 %562 }
 0x143   : > { %524 = vperm.xlu1 %1108, %v373_v18  }
 0x147   : > { %1109 = vset.pattern.permute.xlu1 %v1355_v10 }
 0x148   : > { %546 = vperm.xlu1 %1109, %v372_v16  }
 0x14c   : > { %1112 = vset.pattern.permute.xlu1 %v1356_v11 }
 0x14d   : > { %572 = vperm.xlu1 %1112, %v372_v16  }
 0x151   : > { %576 = vperm.xlu1 %1112, %v373_v18  }
 0x19d   : > { %v390_v47 = vpop.permute.xlu1 %389 }
 0x19e   : > { %v397_v14 = vsel %vm383_vm2, %v390_v47, 0.0  ;;  %v398_v15 = vsel %vm384_vm3, %v390_v47, 0.0  ;;  %vm544_vm2 = vcmp.eq.s32.totalorder %v1698_v57, %v1687_v43  ;;  %vm1899_vm3 = vcmp.eq.s32.totalorder %v1698_v57, %v1681_v39 }
 0x1a1   : > { %v395_v56 = vpop.permute.xlu0 %394 }
 0x1a2   : > { %v417_v48 = vpop.permute.xlu1 %416  ;;  %v399_v63 = vsel %vm385_vm4, %v395_v56, 0.0  ;;  %v400_v0 = vsel %vm386_vm5, %v395_v56, 0.0  ;;  %vm515_vm4 = vcmp.eq.s32.totalorder %v1656_v13, %v1685_v41  ;;  %vm517_vm5 = vcmp.eq.s32.totalorder %v1656_v13, %v1693_v51 }
 0x1a3   : > { %v423_v4 = vsel %vm411_vm8, %v417_v48, 0.0  ;;  %v424_v5 = vsel %vm412_vm9, %v417_v48, 0.0  ;;  %vm518_vm8 = vcmp.eq.s32.totalorder %v1698_v57, %v1693_v51  ;;  %vm543_vm9 = vcmp.eq.s32.totalorder %v1656_v13, %v1687_v43 }
 0x1a4   : > { %v427_v18 = vadd.f32 %v423_v4, %v397_v14  ;;  %v428_v19 = vadd.f32 %v424_v5, %v398_v15 }
 0x1a6   : > { %v421_v50 = vpop.permute.xlu1 %420  ;;  %v447_v59 = vpop.permute.xlu0 %446 }
 0x1a7   : > { %v425_v60 = vsel %vm413_vm6, %v421_v50, 0.0  ;;  %v426_v61 = vsel %vm414_vm7, %v421_v50, 0.0  ;;  %vm491_vm6 = vcmp.eq.s32.totalorder %v1656_v13, %v1683_v40  ;;  %vm492_vm7 = vcmp.eq.s32.totalorder %v1698_v57, %v1683_v40 }
 0x1a8   : > { %v429_v1 = vadd.f32 %v425_v60, %v399_v63  ;;  %v430_v2 = vadd.f32 %v426_v61, %v400_v0  ;;  %v451_v7 = vsel %vm439_vm10, %v447_v59, 0.0  ;;  %v452_v8 = vsel %vm440_vm11, %v447_v59, 0.0 }
 0x1a9   : > { %vm1898_vm10 = vcmp.eq.s32.totalorder %v1656_v13, %v1681_v39  ;;  %vm541_vm11 = vcmp.eq.s32.totalorder %v1656_v13, %v1695_v53 }
 0x1aa   : > { %v455_v11 = vadd.f32 %v451_v7, %v429_v1  ;;  %v456_v12 = vadd.f32 %v452_v8, %v430_v2 }
 0x1ab   : > { %v443_v52 = vpop.permute.xlu1 %442  ;;  %v499_v3 = vpop.permute.xlu0 %498 }
 0x1ac   : > { %v449_v16 = vsel %vm437_vm12, %v443_v52, 0.0  ;;  %v450_v17 = vsel %vm438_vm13, %v443_v52, 0.0  ;;  %v503_v28 = vsel %vm491_vm6, %v499_v3, 0.0  ;;  %v504_v29 = vsel %vm492_vm7, %v499_v3, 0.0 }
 0x1ad   : > { %v453_v26 = vadd.f32 %v449_v16, %v427_v18  ;;  %v454_v27 = vadd.f32 %v450_v17, %v428_v19  ;;  %vm542_vm12 = vcmp.eq.s32.totalorder %v1698_v57, %v1695_v53  ;;  %vm1900_vm13 = vcmp.eq.s32.totalorder %v1698_v57, %v1685_v41 }
 0x1b0   : > { %v469_v54 = vpop.permute.xlu1 %468  ;;  %v551_v24 = vpop.permute.xlu0 %550 }
 0x1b1   : > { %v475_v22 = vsel %vm1898_vm10, %v469_v54, 0.0  ;;  %v476_v23 = vsel %vm1899_vm3, %v469_v54, 0.0  ;;  %v555_v41 = vsel %vm543_vm9, %v551_v24, 0.0  ;;  %v556_v53 = vsel %vm544_vm2, %v551_v24, 0.0 }
 0x1b2   : > { %v479_v34 = vadd.f32 %v475_v22, %v453_v26  ;;  %v480_v35 = vadd.f32 %v476_v23, %v454_v27 }
 0x1b4   : > { %v473_v55 = vpop.permute.xlu1 %472 }
 0x1b5   : > { %v477_v9 = vsel %vm465_vm0, %v473_v55, 0.0  ;;  %v478_v10 = vsel %vm466_vm1, %v473_v55, 0.0  ;;  %v566_v40 = vpop.permute.xlu0 %565 }
 0x1b6   : > { %v481_v20 = vadd.f32 %v477_v9, %v455_v11  ;;  %v482_v21 = vadd.f32 %v478_v10, %v456_v12  ;;  %vm569_vm0 = vcmp.eq.s32.totalorder %v1656_v13, %v566_v40  ;;  %vm570_vm1 = vcmp.eq.s32.totalorder %v1698_v57, %v566_v40 }
 0x1b8   : > { %v507_v36 = vadd.f32 %v503_v28, %v481_v20  ;;  %v508_v37 = vadd.f32 %v504_v29, %v482_v21 }
 0x1b9   : > { %v495_v58 = vpop.permute.xlu1 %494 }
 0x1ba   : > { %v501_v30 = vsel %vm489_vm14, %v495_v58, 0.0  ;;  %v502_v31 = vsel %vm490_vm15, %v495_v58, 0.0  ;;  %vm567_vm14 = vcmp.eq.s32.totalorder %v1656_v13, %v1689_v45  ;;  %vm568_vm15 = vcmp.eq.s32.totalorder %v1698_v57, %v1689_v45 }
 0x1bb   : > { %v505_v42 = vadd.f32 %v501_v30, %v479_v34  ;;  %v506_v44 = vadd.f32 %v502_v31, %v480_v35 }
 0x1be   : > { %v521_v62 = vpop.permute.xlu1 %520 }
 0x1bf   : > { %v527_v38 = vsel %vm515_vm4, %v521_v62, 0.0  ;;  %v528_v39 = vsel %vm1900_vm13, %v521_v62, 0.0 }
 0x1c0   : > { %v531_v51 = vadd.f32 %v527_v38, %v505_v42  ;;  %v532_v52 = vadd.f32 %v528_v39, %v506_v44 }
 0x1c2   : > { %v525_v6 = vpop.permute.xlu1 %524 }
 0x1c3   : > { %v529_v32 = vsel %vm517_vm5, %v525_v6, 0.0  ;;  %v530_v33 = vsel %vm518_vm8, %v525_v6, 0.0 }
 0x1c4   : > { %v533_v46 = vadd.f32 %v529_v32, %v507_v36  ;;  %v534_v47 = vadd.f32 %v530_v33, %v508_v37 }
 0x1c6   : > { %v559_v59 = vadd.f32 %v555_v41, %v533_v46  ;;  %v560_v60 = vadd.f32 %v556_v53, %v534_v47 }
 0x1c7   : > { %v547_v25 = vpop.permute.xlu1 %546 }
 0x1c8   : > { %v553_v49 = vsel %vm541_vm11, %v547_v25, 0.0  ;;  %v554_v50 = vsel %vm542_vm12, %v547_v25, 0.0 }
 0x1c9   : > { %v557_v45 = vadd.f32 %v553_v49, %v531_v51  ;;  %v558_v56 = vadd.f32 %v554_v50, %v532_v52 }
 0x1cc   : > { %v573_v48 = vpop.permute.xlu1 %572 }
 0x1cd   : > { %v579_v54 = vsel %vm567_vm14, %v573_v48, 0.0  ;;  %v580_v55 = vsel %vm568_vm15, %v573_v48, 0.0 }
 0x1ce   : > { %v583_v63 = vadd.f32 %v579_v54, %v557_v45  ;;  %v584_v13 = vadd.f32 %v580_v55, %v558_v56 }
 0x1d0   : > { %v577_v58 = vpop.permute.xlu1 %576 }
 0x1d1   : > { %v581_v61 = vsel %vm569_vm0, %v577_v58, 0.0  ;;  %v582_v62 = vsel %vm570_vm1, %v577_v58, 0.0 }
 0x1d2   : > { %v585_v0 = vadd.f32 %v581_v61, %v559_v59  ;;  %v586_v1 = vadd.f32 %v582_v62, %v560_v60 }
 0x1d4   : > { %v587_v2 = vpack.c.bf16 %v585_v0, %v583_v63  ;;  %v588_v3 = vpack.c.bf16 %v586_v1, %v584_v13 }
 0x1d6   : > { %749 = vmatprep.mubr.bf16.mxu0 %v588_v3 }
 0x1d7   : > { %750 = vmatmul.mubr.bf16.vlgmr.msra.gmra.mrb[0].mxu0 %v587_v2 }
 0x2aa   : > { %v987_v43 = vpop.f32.mrb[0].mxu0 }
 0x2ab   : > { %v988_v57 = vpop.f32.mrb[1].mxu0 }
 0x2ac   : > { %v989_v4 = vadd.f32 %v988_v57, %v987_v43  ;;  %v990_v5 = vpop.f32.mrb[2].mxu0 }
 0x2ad   : > { %v991_v6 = vpop.f32.mrb[3].mxu0 }
 0x2ae   : > { %758 = vst [vmem:[%s348_s21] sm:$0xff] %v989_v4  ;;  %v992_v7 = vadd.f32 %v991_v6, %v990_v5 }
 0x2b0   : > { %759 = vst [vmem:[%s348_s21 + $0x8] sm:$0xff] %v992_v7 }
 0x2b1   : > { %1262 = shalt.err (!%p1259_p5)
}
 0x2b2   : > { %s1263_s1 = scalar_lea.hbm %s1815_s29, 256  ;;  %s1267_s8 = scalar_lea.hbm %s1868_s4, 512 }
 0x2b3   : > { %p1264_p0 = scmp.ne.s32.totalorder %s1815_s29, %s1263_s1  ;;  %p1268_p9 = scmp.lt.u32.totalorder %s1815_s29, %s1868_s4 }
 0x2b4   : > { %p1269_p4 = scmp.lt.u32.totalorder %s1267_s8, %s1263_s1  ;;  %p1271_p7 = scmp.lt.u32.totalorder %s1263_s1, %s1815_s29 }
 0x2b5   : > { %p1265_p3 = pnand %p1264_p0, %p1901_p12 }
 0x2b6   : > { %p1270_p10 = por %p1269_p4, %p1268_p9 }
 0x2b7   : > { %p1266_p8 = pneg %p1265_p3 }
 0x2b8   : > { %p1272_p1 = por %p1271_p7, %p1270_p10 }
 0x2ba   : > { %p1273_p6 = pnand %p1272_p1, %p1266_p8 }
 0x2bc   : > { %1276 = shalt.err (!%p1273_p6)
}
 0x2bd   : > { %s1358_s24 = smov 128   ;;  %s1359_s12 = smov 256  }
 0x2be   : > { %s1360_s7 = smov 8  }
 0x2bf   : > { %1001 = dma.vmem_to_hbm [thread:$0]  (%p1901_p12), %s1810_s27, 256, %s1815_s29, %s761_s23, %s1358_s24, %s1359_s12, %s1360_s7  }
 0x2c0 PF: > { %s791_s21 = sand.u32 1, %s1319_s15   ;;  %p1902_p13 = scmp.ne.s32.totalorder %s1884_s30, 0 }
 0x2c1   : > { %p1903_p11 = scmp.ge.s32.totalorder %s1339_s20, 2  ;;  %s792_s0 = scalar_lea.sflag [#allocation4], %s791_s21 }
 0x2c3   : > { %p1017_p2 = pnand %p1903_p11, %p1902_p13 }
 0x2c5   : > { %1314 = dma.done.wait (!%p1017_p2), %s792_s0, 256  }
 0x2c6   : > { %1316 = vsyncadd (!%p1017_p2), %s792_s0, 4294967040  ;;  %s26_s20 = sadd.s32 1, %s1339_s20   ;;  %s1904_s26 = sld [smem:[#allocation16_spill]] }
 0x2c7   : > { %p23_p5 = scmp.ge.s32.totalorder %s26_s20, 4   ;;  %s1905_s28 = sld [smem:[#allocation15_spill]] }
 0x2c8   : > { %s1906_s15 = smov %s1323_s16  ;;  %s1907_s16 = smov %s1327_s17 }
 0x2c9   : > { %s1909_s18 = smov %s1335_s19  ;;  %25 = sbr.rel (!%p23_p5) target bundleno = 13 (0xd), region = 118 }
 0x2cc   : > { %s1908_s17 = smov %s1904_s26 }
 0x2cd   : > { %s1910_s19 = smov %s1905_s28 }
 0x2d0   :  { %797 = vsyncpa [#allocation3], 1 }
 0x2d1   :  { %799 = vsyncpa [#allocation3 + $0x1], 1 }
 0x2d2   :  { %800 = vsyncpa [#allocation6], 1 }
 0x2d3   :  { %802 = vsyncpa [#allocation6 + $0x1], 1 }
 0x2d4   :  { %803 = vsyncpa [#allocation9], 1 }
 0x2d5   :  { %805 = vsyncpa [#allocation9 + $0x1], 1 }
 0x2d6   :  { %806 = vsyncpa [#allocation4], 1 }
 0x2d7   :  { %808 = vsyncpa [#allocation4 + $0x1], 1 }

</bundles_post_ra>
